<compile_context>
chip_gen: v7x
topology: tpu7x:2x2x1
jax: 0.10.0
libtpu: 0.0.40
codegen_flags: <defaults>
</compile_context>

<pallas_src>
import functools
import math

import jax
import jax.numpy as jnp
import numpy as np
from jax import lax
from jax.experimental import pallas as pl
from jax.experimental.pallas import tpu as pltpu


def _round_up(x, m):
    return (x + m - 1) // m * m


# ---------------------------------------------------------------------------
# Stage 1: input projection  gates_x = x @ W_ih^T + (b_ih + b_hh)    (parallel)
# x / gates_x presented as 2-D (T_pad*Bp, .) so blocks are lane/sublane dense
# and no in-kernel reshape is needed.
# ---------------------------------------------------------------------------
def _input_proj_kernel(x_ref, wih_ref, b_ref, gx_ref):
    gx = jnp.dot(x_ref[...], wih_ref[...], preferred_element_type=jnp.float32)
    gx_ref[...] = (gx + b_ref[...]).astype(gx_ref.dtype)


# ---------------------------------------------------------------------------
# Stage 2: sequential LSTM recurrence (only h @ W_hh^T per step).    (serial)
# ---------------------------------------------------------------------------
def _lstm_recurrence_kernel(gx_ref, seqlen_ref, whh_ref, h0_ref, c0_ref,
                            y_ref, hn_ref, cn_ref, h_sc, c_sc,
                            *, hidden_pad, time_chunk):
    ck = pl.program_id(0)
    Hp = hidden_pad
    Tc = time_chunk

    @pl.when(ck == 0)
    def _():
        h_sc[...] = h0_ref[...]
        c_sc[...] = c0_ref[...]

    seq_len = seqlen_ref[...]                       # (Bp, 1) int32

    def step(s, carry):
        t = ck * Tc + s                             # global timestep
        gx = gx_ref[s].astype(jnp.float32)          # (Bp, 4Hp), bias folded in
        h = h_sc[...]
        c = c_sc[...]
        # RHS streamed from VMEM each step (don't pin 32 vregs across the unroll).
        gates = gx + jnp.dot(h.astype(jnp.bfloat16), whh_ref[...],
                             preferred_element_type=jnp.float32)
        # PyTorch gate layout [i, f, g, o]; each slice is Hp (=128k) lanes wide.
        i_g = jax.nn.sigmoid(gates[:, 0 * Hp:1 * Hp])
        f_g = jax.nn.sigmoid(gates[:, 1 * Hp:2 * Hp])
        g_g = jnp.tanh(gates[:, 2 * Hp:3 * Hp])
        o_g = jax.nn.sigmoid(gates[:, 3 * Hp:4 * Hp])
        c_new = f_g * c + i_g * g_g
        h_new = o_g * jnp.tanh(c_new)
        # packed-sequence semantics: freeze state past seq_len, emit zeros there.
        mask = t < seq_len                          # (Bp, 1) bool -> vsel
        h_sc[...] = jnp.where(mask, h_new, h)
        c_sc[...] = jnp.where(mask, c_new, c)
        y_ref[s] = jnp.where(mask, h_new, 0.0).astype(y_ref.dtype)
        return carry

    lax.fori_loop(0, Tc, step, 0, unroll=True)

    @pl.when(ck == pl.num_programs(0) - 1)
    def _():
        hn_ref[...] = h_sc[...]
        cn_ref[...] = c_sc[...]


# ---------------------------------------------------------------------------
# Stage 3a: per-row log-sum-exp over V, tiled over v (online max/sum). (parallel, arbitrary)
# ---------------------------------------------------------------------------
def _decode_lse_kernel(y_ref, wdec_ref, bdec_ref, lse_ref, m_sc, l_sc):
    v = pl.program_id(1)

    @pl.when(v == 0)
    def _():
        m_sc[...] = jnp.full_like(m_sc, -1e30)
        l_sc[...] = jnp.zeros_like(l_sc)

    logits = (jnp.dot(y_ref[...], wdec_ref[...], preferred_element_type=jnp.float32)
              + bdec_ref[...])
    m_old = m_sc[...]
    m_new = jnp.maximum(m_old, jnp.max(logits, axis=-1, keepdims=True))
    l_sc[...] = (l_sc[...] * jnp.exp(m_old - m_new)
                 + jnp.sum(jnp.exp(logits - m_new), axis=-1, keepdims=True))
    m_sc[...] = m_new

    @pl.when(v == pl.num_programs(1) - 1)
    def _():
        lse_ref[...] = m_sc[...] + jnp.log(l_sc[...])


# ---------------------------------------------------------------------------
# Stage 3b: write log-probs, tiled over v (lane-dense output blocks). (parallel)
# ---------------------------------------------------------------------------
def _decode_write_kernel(y_ref, wdec_ref, bdec_ref, lse_ref, out_ref):
    logits = (jnp.dot(y_ref[...], wdec_ref[...], preferred_element_type=jnp.float32)
              + bdec_ref[...])
    out_ref[...] = logits - lse_ref[...]


def simple_rnn_forward(params, input_tokens, hidden_state, seq_len, *,
                       time_chunk_rec=16, time_chunk_par=32, v_tile=2048):
    """Pallas equivalent of SimpleRNN.forward.

    Returns (out, (h_n, c_n)) with out: (T, B, V) log-probs, T = max(seq_len),
    h_n/c_n: (1, B, H).  seq_len must be concrete at trace time (like
    pack_padded_sequence's lengths).
    """
    emb = params["embedding"]
    w_ih, w_hh = params["w_ih"], params["w_hh"]
    b_ih, b_hh = params["b_ih"], params["b_hh"]
    w_dec, b_dec = params["w_dec"], params["b_dec"]

    max_len, B = input_tokens.shape
    H = emb.shape[1]
    V = w_dec.shape[0]
    seq_len_np = np.asarray(seq_len)
    T = int(seq_len_np.max())                 # pad_packed_sequence output length

    f32, bf16 = jnp.float32, jnp.bfloat16

    # hardware-aligned padded sizes
    Hp = _round_up(H, 128)                    # lane-aligned hidden
    Bp = _round_up(B, 8)                      # sublane-aligned batch
    Vp = _round_up(V, 128)                    # lane-aligned vocab
    Vt = min(int(v_tile), Vp)                 # vocab tile for the decode
    Vp = _round_up(Vp, Vt)
    n_vt = Vp // Vt

    Tc_rec = int(time_chunk_rec)              # serial-stage chunk
    Tc_par = int(time_chunk_par)              # parallel-stage chunk (Tc_par*Bp >= 256)
    T_pad = _round_up(T, math.lcm(Tc_rec, Tc_par))
    n_chunks_rec = T_pad // Tc_rec
    n_chunks_par = T_pad // Tc_par

    # 48 MiB: above scoped default, headroom under v7x's 64 MiB physical VMEM.
    vmem_limit = 48 * 1024 * 1024

    # --- weight prep (glue, runs once) -------------------------------------
    def pad_gate_weight_t(w):                 # (4H, H) -> (Hp, 4Hp), transposed
        out = jnp.zeros((Hp, 4 * Hp), f32)
        for g in range(4):
            out = out.at[:H, g * Hp:g * Hp + H].set(w[g * H:(g + 1) * H, :].T)
        return out.astype(bf16)

    wih_t = pad_gate_weight_t(w_ih)                             # (Hp, 4Hp) bf16
    whh_t = pad_gate_weight_t(w_hh)                             # (Hp, 4Hp) bf16

    b_all = b_ih + b_hh
    bias = jnp.zeros((1, 4 * Hp), f32)
    for g in range(4):
        bias = bias.at[0, g * Hp:g * Hp + H].set(b_all[g * H:(g + 1) * H])

    wdec_t = jnp.zeros((Hp, Vp), f32).at[:H, :V].set(w_dec.T).astype(bf16)
    # padded vocab lanes get a very negative bias so they vanish in log_softmax
    bdec = jnp.full((1, Vp), -1e9, f32).at[0, :V].set(b_dec)

    # embedding lookup (gather stays in XLA); x staged bf16, padded (T_pad, Bp, Hp)
    emb_pad = jnp.zeros((emb.shape[0], Hp), bf16).at[:, :H].set(emb.astype(bf16))
    x3 = jnp.zeros((T_pad, Bp, Hp), bf16).at[:T, :B, :].set(emb_pad[input_tokens[:T]])
    x2d = x3.reshape(T_pad * Bp, Hp)

    seqlen = jnp.zeros((Bp, 1), jnp.int32).at[:B, 0].set(
        jnp.asarray(seq_len_np, jnp.int32))
    h0 = jnp.zeros((Bp, Hp), f32).at[:B, :H].set(hidden_state[0])
    c0 = jnp.zeros((Bp, Hp), f32).at[:B, :H].set(hidden_state[1])

    # --- stage 1: input projection (parallel over time chunks, bf16 staged) --
    gates_x2d = pl.pallas_call(
        _input_proj_kernel,
        out_shape=jax.ShapeDtypeStruct((T_pad * Bp, 4 * Hp), bf16),
        grid_spec=pltpu.PrefetchScalarGridSpec(
            num_scalar_prefetch=0,
            grid=(n_chunks_par,),
            in_specs=[
                pl.BlockSpec((Tc_par * Bp, Hp), lambda i: (i, 0)),    # x chunk
                pl.BlockSpec((Hp, 4 * Hp), lambda i: (0, 0)),         # W_ih^T
                pl.BlockSpec((1, 4 * Hp), lambda i: (0, 0)),          # bias
            ],
            out_specs=pl.BlockSpec((Tc_par * Bp, 4 * Hp), lambda i: (i, 0)),
        ),
        compiler_params=pltpu.CompilerParams(
            dimension_semantics=("parallel",),
            vmem_limit_bytes=vmem_limit),
    )(x2d, wih_t, bias)
    gates_x = gates_x2d.reshape(T_pad, Bp, 4 * Hp)

    # --- stage 2: serial LSTM recurrence -------------------------------------
    rec_kernel = functools.partial(_lstm_recurrence_kernel,
                                   hidden_pad=Hp, time_chunk=Tc_rec)
    y, h_n, c_n = pl.pallas_call(
        rec_kernel,
        out_shape=(
            jax.ShapeDtypeStruct((T_pad, Bp, Hp), bf16),
            jax.ShapeDtypeStruct((Bp, Hp), f32),
            jax.ShapeDtypeStruct((Bp, Hp), f32),
        ),
        grid_spec=pltpu.PrefetchScalarGridSpec(
            num_scalar_prefetch=0,
            grid=(n_chunks_rec,),
            in_specs=[
                pl.BlockSpec((Tc_rec, Bp, 4 * Hp), lambda i: (i, 0, 0)),  # gates_x
                pl.BlockSpec((Bp, 1), lambda i: (0, 0)),                  # seq_len
                pl.BlockSpec((Hp, 4 * Hp), lambda i: (0, 0)),             # W_hh^T
                pl.BlockSpec((Bp, Hp), lambda i: (0, 0)),                 # h0
                pl.BlockSpec((Bp, Hp), lambda i: (0, 0)),                 # c0
            ],
            out_specs=[
                pl.BlockSpec((Tc_rec, Bp, Hp), lambda i: (i, 0, 0)),      # y chunk
                pl.BlockSpec((Bp, Hp), lambda i: (0, 0)),                 # h_n
                pl.BlockSpec((Bp, Hp), lambda i: (0, 0)),                 # c_n
            ],
            scratch_shapes=[
                pltpu.VMEM((Bp, Hp), f32),                                # h carry
                pltpu.VMEM((Bp, Hp), f32),                                # c carry
            ],
        ),
        compiler_params=pltpu.CompilerParams(
            dimension_semantics=("arbitrary",),                           # recurrence
            vmem_limit_bytes=vmem_limit),
    )(gates_x, seqlen, whh_t, h0, c0)

    y2d = y.reshape(T_pad * Bp, Hp)

    # --- stage 3a: log-sum-exp over V (V-tiled, online) ----------------------
    lse = pl.pallas_call(
        _decode_lse_kernel,
        out_shape=jax.ShapeDtypeStruct((T_pad * Bp, 1), f32),
        grid_spec=pltpu.PrefetchScalarGridSpec(
            num_scalar_prefetch=0,
            grid=(n_chunks_par, n_vt),
            in_specs=[
                pl.BlockSpec((Tc_par * Bp, Hp), lambda i, v: (i, 0)),     # y chunk
                pl.BlockSpec((Hp, Vt), lambda i, v: (0, v)),              # W_dec^T tile
                pl.BlockSpec((1, Vt), lambda i, v: (0, v)),               # b_dec tile
            ],
            out_specs=pl.BlockSpec((Tc_par * Bp, 1), lambda i, v: (i, 0)),
            scratch_shapes=[
                pltpu.VMEM((Tc_par * Bp, 1), f32),                        # running max
                pltpu.VMEM((Tc_par * Bp, 1), f32),                        # running sum
            ],
        ),
        compiler_params=pltpu.CompilerParams(
            dimension_semantics=("parallel", "arbitrary"),
            vmem_limit_bytes=vmem_limit),
    )(y2d, wdec_t, bdec)

    # --- stage 3b: write log-probs (V-tiled, lane-dense output) --------------
    out2d = pl.pallas_call(
        _decode_write_kernel,
        out_shape=jax.ShapeDtypeStruct((T_pad * Bp, Vp), f32),
        grid_spec=pltpu.PrefetchScalarGridSpec(
            num_scalar_prefetch=0,
            grid=(n_chunks_par, n_vt),
            in_specs=[
                pl.BlockSpec((Tc_par * Bp, Hp), lambda i, v: (i, 0)),     # y chunk
                pl.BlockSpec((Hp, Vt), lambda i, v: (0, v)),              # W_dec^T tile
                pl.BlockSpec((1, Vt), lambda i, v: (0, v)),               # b_dec tile
                pl.BlockSpec((Tc_par * Bp, 1), lambda i, v: (i, 0)),      # lse chunk
            ],
            out_specs=pl.BlockSpec((Tc_par * Bp, Vt), lambda i, v: (i, v)),
        ),
        compiler_params=pltpu.CompilerParams(
            dimension_semantics=("parallel", "parallel"),
            vmem_limit_bytes=vmem_limit),
    )(y2d, wdec_t, bdec, lse)

    out = out2d.reshape(T_pad, Bp, Vp)[:T, :B, :V]
    return out, (h_n[:B, :H][None], c_n[:B, :H][None])


def reference_forward(params, input_tokens, hidden_state, seq_len):
    """Pure-JAX f32 reference reproducing the PyTorch semantics (validation)."""
    emb = params["embedding"]
    w_ih, w_hh = params["w_ih"], params["w_hh"]
    b_ih, b_hh = params["b_ih"], params["b_hh"]
    w_dec, b_dec = params["w_dec"], params["b_dec"]
    seq_len_np = np.asarray(seq_len)
    T = int(seq_len_np.max())
    H = emb.shape[1]

    x = emb[input_tokens[:T]]
    h, c = hidden_state[0], hidden_state[1]
    ys = []
    for t in range(T):
        gates = x[t] @ w_ih.T + b_ih + h @ w_hh.T + b_hh
        i_g = jax.nn.sigmoid(gates[:, 0 * H:1 * H])
        f_g = jax.nn.sigmoid(gates[:, 1 * H:2 * H])
        g_g = jnp.tanh(gates[:, 2 * H:3 * H])
        o_g = jax.nn.sigmoid(gates[:, 3 * H:4 * H])
        c_new = f_g * c + i_g * g_g
        h_new = o_g * jnp.tanh(c_new)
        m = jnp.asarray((t < seq_len_np).astype(np.float32))[:, None]
        h = m * h_new + (1.0 - m) * h
        c = m * c_new + (1.0 - m) * c
        ys.append(m * h_new)
    y = jnp.stack(ys, axis=0)                        # (T, B, H)
    logits = y @ w_dec.T + b_dec                     # (T, B, V)
    out = jax.nn.log_softmax(logits, axis=2)
    return out, (h[None], c[None])


def init_params(key, vocab_size, hidden_size):
    ks = jax.random.split(key, 7)
    k = 1.0 / np.sqrt(hidden_size)
    return {
        "embedding": jax.random.normal(ks[0], (vocab_size, hidden_size), jnp.float32),
        "w_ih": jax.random.uniform(ks[1], (4 * hidden_size, hidden_size), jnp.float32, -k, k),
        "w_hh": jax.random.uniform(ks[2], (4 * hidden_size, hidden_size), jnp.float32, -k, k),
        "b_ih": jax.random.uniform(ks[3], (4 * hidden_size,), jnp.float32, -k, k),
        "b_hh": jax.random.uniform(ks[4], (4 * hidden_size,), jnp.float32, -k, k),
        "w_dec": jax.random.uniform(ks[5], (vocab_size, hidden_size), jnp.float32, -k, k),
        "b_dec": jax.random.uniform(ks[6], (vocab_size,), jnp.float32, -k, k),
    }


if __name__ == "__main__":
    vocab_size, hidden_size = 32, 32
    max_len, batch = 8, 4

    key = jax.random.PRNGKey(0)
    kp, kt, kh = jax.random.split(key, 3)
    params = init_params(kp, vocab_size, hidden_size)

    input_tokens = jax.random.randint(kt, (max_len, batch), 0, vocab_size, jnp.int32)
    hidden_state = jax.random.normal(kh, (2, batch, hidden_size), jnp.float32)
    seq_len = np.array([8, 7, 5, 3], dtype=np.int64)   # sorted descending (pack_padded contract)

    out, (h_n, c_n) = simple_rnn_forward(params, input_tokens, hidden_state, seq_len)
    jax.block_until_ready((out, h_n, c_n))

    # f32 reference; tolerances relaxed because the kernel uses bf16 MXU matmuls
    # and bf16-staged intermediates.
    out_ref, (h_ref, c_ref) = reference_forward(params, input_tokens, hidden_state, seq_len)
    np.testing.assert_allclose(np.asarray(out), np.asarray(out_ref), rtol=5e-2, atol=7e-2)
    np.testing.assert_allclose(np.asarray(h_n), np.asarray(h_ref), rtol=5e-2, atol=7e-2)
    np.testing.assert_allclose(np.asarray(c_n), np.asarray(c_ref), rtol=5e-2, atol=7e-2)

    print("KERNEL_OK")
</pallas_src>

<mosaic_0001>
module attributes {stable_mosaic.version = 11 : i64} {
  func.func @_input_proj_kernel(%arg0: i32, %arg1: memref<256x128xbf16, #tpu.memory_space<vmem>>, %arg2: memref<128x512xbf16, #tpu.memory_space<vmem>>, %arg3: memref<1x512xf32, #tpu.memory_space<vmem>>, %arg4: memref<256x512xbf16, #tpu.memory_space<vmem>>) attributes {dimension_semantics = [#tpu.dimension_semantics<parallel>], iteration_bounds = array<i64: 1>, scalar_prefetch = 0 : i64, scratch_operands = 0 : i64, tpu.core_type = #tpu.core_type<tc>, window_params = [{transform_indices = @transform_0, window_bounds = array<i64: 256, 128>}, {pipeline_mode = #tpu.pipeline_mode<synchronous>, transform_indices = @transform_1, window_bounds = array<i64: 128, 512>}, {pipeline_mode = #tpu.pipeline_mode<synchronous>, transform_indices = @transform_2, window_bounds = array<i64: 1, 512>}, {transform_indices = @transform_3, window_bounds = array<i64: 256, 512>}]} {
    %c0 = arith.constant 0 : index
    %c0_0 = arith.constant 0 : index
    %0 = vector.load %arg1[%c0, %c0_0] : memref<256x128xbf16, #tpu.memory_space<vmem>>, vector<256x128xbf16>
    %c0_1 = arith.constant 0 : index
    %c0_2 = arith.constant 0 : index
    %1 = vector.load %arg2[%c0_1, %c0_2] : memref<128x512xbf16, #tpu.memory_space<vmem>>, vector<128x512xbf16>
    %cst = arith.constant dense<0.000000e+00> : vector<256x512xf32>
    %2 = tpu.matmul %0, %1, %cst {dimension_numbers = #tpu.dot_dimension_numbers<[1], [0], [0], [1], [0, 0, 1, 1], [], []>} : vector<256x128xbf16>, vector<128x512xbf16>, vector<256x512xf32> -> vector<256x512xf32>
    %c0_3 = arith.constant 0 : index
    %c0_4 = arith.constant 0 : index
    %3 = vector.load %arg3[%c0_3, %c0_4] : memref<1x512xf32, #tpu.memory_space<vmem>>, vector<1x512xf32>
    %4 = vector.broadcast %3 : vector<1x512xf32> to vector<256x512xf32>
    %5 = arith.addf %2, %4 : vector<256x512xf32>
    %6 = arith.truncf %5 : vector<256x512xf32> to vector<256x512xbf16>
    %c0_5 = arith.constant 0 : index
    %c0_6 = arith.constant 0 : index
    %7 = vector.load %arg4[%c0_5, %c0_6] : memref<256x512xbf16, #tpu.memory_space<vmem>>, vector<256x512xbf16>
    tpu.vector_store %arg4[%c0_5, %c0_6], %6 {strides = array<i32>} : memref<256x512xbf16, #tpu.memory_space<vmem>>, vector<256x512xbf16>,
    return
  }
  func.func @transform_0(%arg0: i32) -> (i32, i32) {
    %c0_i32 = arith.constant 0 : i32
    %c0_i32_0 = arith.constant 0 : i32
    return %arg0, %c0_i32 : i32, i32
  }
  func.func @transform_1(%arg0: i32) -> (i32, i32) {
    %c0_i32 = arith.constant 0 : i32
    %c0_i32_0 = arith.constant 0 : i32
    %c0_i32_1 = arith.constant 0 : i32
    return %c0_i32, %c0_i32_0 : i32, i32
  }
  func.func @transform_2(%arg0: i32) -> (i32, i32) {
    %c0_i32 = arith.constant 0 : i32
    %c0_i32_0 = arith.constant 0 : i32
    %c0_i32_1 = arith.constant 0 : i32
    return %c0_i32, %c0_i32_0 : i32, i32
  }
  func.func @transform_3(%arg0: i32) -> (i32, i32) {
    %c0_i32 = arith.constant 0 : i32
    %c0_i32_0 = arith.constant 0 : i32
    return %arg0, %c0_i32 : i32, i32
  }
}

</mosaic_0001>

<bundles_post_ra>
// kernel: tpu_custom_call.1
= control target key start
LH: loop header
LB: loop body
LE: loop exit
PB: predicated region body
PF: predicated region fallthrough
CT: control target
= control target key end

     0   :  { %8 = vsyncpa [#allocation3], 0  ;;  %s1799_s0 = inlined_call_operand.hbm [shape: bf16[256,128], index: 0, kind: input, shape index: {}]   ;;  %s1800_s1 = inlined_call_operand.hbm [shape: bf16[128,512], index: 1, kind: input, shape index: {}]   ;;  %s1801_s2 = inlined_call_operand.vmem [shape: f32[1,512], index: 2, kind: input, shape index: {}]   ;;  %s1802_s3 = inlined_call_operand.hbm [shape: bf16[256,512], index: 3, kind: output, shape index: {}]  }
   0x1   :  { %9 = vsyncpa [#allocation6], 0 }
   0x2   :  { %10 = vsyncpa [#allocation4], 0  ;;  %s1558_s12 = smov [#allocation2]   ;;  %s1486_s16 = scalar_lea.hbm %s1799_s0, 2048 }
   0x3   :  { %s16_s13 = sshll.u32 %s1558_s12, 4  ;;  %p1487_p0 = scmp.ne.s32.totalorder %s1799_s0, %s1486_s16  ;;  %s17_s13 = int_to_ptr.vmem [resolvable:$true] %s16_s13 }
   0x4   :  { %p1490_p1 = scmp.lt.u32.totalorder %s1486_s16, %s1799_s0 }
   0x6   :  { %p1492_p2 = pnand %p1490_p1, %p1487_p0 }
   0x8   :  { %1495 = shalt.err (!%p1492_p2)
}
   0x9   :  { %s1496_s21 = scalar_lea.vmem %s17_s13, 2048  ;;  %p1501_p4 = scmp.lt.s32.totalorder %s17_s13, %s17_s13 }
   0xa   :  { %p1497_p3 = scmp.ne.s32.totalorder %s17_s13, %s1496_s21  ;;  %p1502_p5 = scmp.lt.s32.totalorder %s1496_s21, %s1496_s21 }
   0xc   :  { %p1503_p6 = por %p1502_p5, %p1501_p4 }
   0xe   :  { %p1504_p7 = pnand %p1503_p6, %p1497_p3 }
  0x10   :  { %1507 = shalt.err (!%p1504_p7)
}
  0x11   :  { %s1559_s22 = smov 64   ;;  %s1560_s23 = smov 4  }
  0x12   :  { %22 = dma.hbm_to_vmem [thread:$0]  %s1799_s0, 2048, %s17_s13, [#allocation3], %s1559_s22, %s1559_s22, %s1560_s23  }
  0x13   :  { %s1561_s26 = smov [#allocation5]   ;;  %s1508_s30 = scalar_lea.hbm %s1800_s1, 4096 }
  0x14   :  { %s28_s27 = sshll.u32 %s1561_s26, 4  ;;  %p1509_p8 = scmp.ne.s32.totalorder %s1800_s1, %s1508_s30  ;;  %s29_s27 = int_to_ptr.vmem [resolvable:$true] %s28_s27 }
  0x15   :  { %p1512_p9 = scmp.lt.u32.totalorder %s1508_s30, %s1800_s1 }
  0x17   :  { %p1514_p10 = pnand %p1512_p9, %p1509_p8 }
  0x19   :  { %1517 = shalt.err (!%p1514_p10)
}
  0x1a   :  { %s1518_s8 = scalar_lea.vmem %s29_s27, 4096  ;;  %p1523_p12 = scmp.lt.s32.totalorder %s29_s27, %s29_s27 }
  0x1b   :  { %p1519_p11 = scmp.ne.s32.totalorder %s29_s27, %s1518_s8  ;;  %p1524_p13 = scmp.lt.s32.totalorder %s1518_s8, %s1518_s8 }
  0x1d   :  { %p1525_p0 = por %p1524_p13, %p1523_p12 }
  0x1f   :  { %p1526_p1 = pnand %p1525_p0, %p1519_p11 }
  0x21   :  { %1529 = shalt.err (!%p1526_p1)
}
  0x22   :  { %s1562_s0 = smov 256   ;;  %s1563_s9 = smov 16  }
  0x23   :  { %34 = dma.hbm_to_vmem [thread:$0]  %s1800_s1, 4096, %s29_s27, [#allocation6], %s1562_s0, %s1562_s0, %s1563_s9  }
  0x24   :  { %1552 = dma.done.wait [#allocation3], 2048  }
  0x25   :  { %1553 = vsyncadd [#allocation3], 4294965248 }
  0x26   :  { %1554 = dma.done.wait [#allocation6], 4096  }
  0x27   :  { %1555 = vsyncadd [#allocation6], 4294963200  ;;  %v1564_v0 = vmov 0   ;;  %v1422_v1 = vld [vmem:[#allocation5 + $0x4] ss:$16 sps:$4 sm:$0xff]   ;;  %v1471_v34 = vld [vmem:[#allocation2 + $0x8] sm:$0xff]   ;;  %v110_v49 = vlaneseq }
  0x28   :  { %418 = vmatprep.mubr.bf16.mxu0 %v1564_v0  ;;  %611 = vmatprep.mubr.bf16.mxu1 %v1564_v0  ;;  %v1424_v2 = vld [vmem:[#allocation5 + $0xc] ss:$16 sps:$4 sm:$0xff]   ;;  %v1426_v3 = vld [vmem:[#allocation5] ss:$16 sps:$4 sm:$0xff]   ;;  %v1427_v4 = vld [vmem:[#allocation5 + $0x8] ss:$16 sps:$4 sm:$0xff]  }
  0x29   :  { %386 = vmatprep.subr.bf16.mxu0 %v1422_v1  ;;  %579 = vmatprep.subr.bf16.mxu1 %v1424_v2  ;;  %v1428_v5 = vld [vmem:[#allocation5 + $0x24] ss:$16 sps:$4 sm:$0xff]   ;;  %v1430_v6 = vld [vmem:[#allocation5 + $0x2c] ss:$16 sps:$4 sm:$0xff]   ;;  %v1432_v7 = vld [vmem:[#allocation5 + $0x20] ss:$16 sps:$4 sm:$0xff]  }
  0x2a   :  { %387 = vmatpush1.bf16.msra.mxu0 %v1426_v3  ;;  %580 = vmatpush1.bf16.msra.mxu1 %v1427_v4  ;;  %v1433_v8 = vld [vmem:[#allocation5 + $0x28] ss:$16 sps:$4 sm:$0xff]   ;;  %v1434_v9 = vld [vmem:[#allocation5 + $0x44] ss:$16 sps:$4 sm:$0xff]   ;;  %v1436_v10 = vld [vmem:[#allocation5 + $0x4c] ss:$16 sps:$4 sm:$0xff]  }
  0x2b   :  { %388 = vmatprep.subr.bf16.mxu0 %v1428_v5  ;;  %581 = vmatprep.subr.bf16.mxu1 %v1430_v6  ;;  %v1438_v11 = vld [vmem:[#allocation5 + $0x40] ss:$16 sps:$4 sm:$0xff]   ;;  %v1439_v12 = vld [vmem:[#allocation5 + $0x48] ss:$16 sps:$4 sm:$0xff]   ;;  %v1440_v13 = vld [vmem:[#allocation5 + $0x64] ss:$16 sps:$4 sm:$0xff]  }
  0x2c   :  { %v1442_v14 = vld [vmem:[#allocation5 + $0x6c] ss:$16 sps:$4 sm:$0xff]   ;;  %v1444_v15 = vld [vmem:[#allocation5 + $0x60] ss:$16 sps:$4 sm:$0xff]   ;;  %v1445_v16 = vld [vmem:[#allocation5 + $0x68] ss:$16 sps:$4 sm:$0xff]  }
  0x2d   :  { %v1446_v17 = vld [vmem:[#allocation5 + $0x84] ss:$16 sps:$4 sm:$0xff]   ;;  %v1448_v18 = vld [vmem:[#allocation5 + $0x8c] ss:$16 sps:$4 sm:$0xff]   ;;  %v1450_v19 = vld [vmem:[#allocation5 + $0x80] ss:$16 sps:$4 sm:$0xff]  }
  0x2e   :  { %389 = vmatpush1.bf16.msra.mxu0 %v1432_v7  ;;  %582 = vmatpush1.bf16.msra.mxu1 %v1433_v8  ;;  %v1451_v20 = vld [vmem:[#allocation5 + $0x88] ss:$16 sps:$4 sm:$0xff]   ;;  %v1452_v21 = vld [vmem:[#allocation5 + $0xa4] ss:$16 sps:$4 sm:$0xff]   ;;  %v1454_v22 = vld [vmem:[#allocation5 + $0xac] ss:$16 sps:$4 sm:$0xff]  }
  0x2f   :  { %390 = vmatprep.subr.bf16.mxu0 %v1434_v9  ;;  %583 = vmatprep.subr.bf16.mxu1 %v1436_v10  ;;  %v1456_v23 = vld [vmem:[#allocation5 + $0xa0] ss:$16 sps:$4 sm:$0xff]   ;;  %v1457_v24 = vld [vmem:[#allocation5 + $0xa8] ss:$16 sps:$4 sm:$0xff]   ;;  %v1458_v25 = vld [vmem:[#allocation5 + $0xc4] ss:$16 sps:$4 sm:$0xff]  }
  0x30   :  { %v1460_v26 = vld [vmem:[#allocation5 + $0xcc] ss:$16 sps:$4 sm:$0xff]   ;;  %v1462_v27 = vld [vmem:[#allocation5 + $0xc0] ss:$16 sps:$4 sm:$0xff]   ;;  %v1463_v28 = vld [vmem:[#allocation5 + $0xc8] ss:$16 sps:$4 sm:$0xff]  }
  0x31   :  { %v1464_v29 = vld [vmem:[#allocation5 + $0xe4] ss:$16 sps:$4 sm:$0xff]   ;;  %v1466_v30 = vld [vmem:[#allocation5 + $0xec] ss:$16 sps:$4 sm:$0xff]   ;;  %v1468_v31 = vld [vmem:[#allocation5 + $0xe0] ss:$16 sps:$4 sm:$0xff]  }
  0x32   :  { %391 = vmatpush1.bf16.msra.mxu0 %v1438_v11  ;;  %584 = vmatpush1.bf16.msra.mxu1 %v1439_v12  ;;  %v1469_v32 = vld [vmem:[#allocation5 + $0xe8] ss:$16 sps:$4 sm:$0xff]   ;;  %v1470_v33 = vld [vmem:[#allocation2] sm:$0xff]   ;;  %v1472_v35 = vld [vmem:[#allocation2 + $0x10] sm:$0xff]   ;;  %v111_v50 = vshrl.u32 %v110_v49, 7 }
  0x33   :  { %392 = vmatprep.subr.bf16.mxu0 %v1440_v13  ;;  %585 = vmatprep.subr.bf16.mxu1 %v1442_v14  ;;  %v1473_v36 = vld [vmem:[#allocation2 + $0x18] sm:$0xff]   ;;  %v1474_v37 = vld [vmem:[#allocation2 + $0x20] sm:$0xff]   ;;  %v1475_v38 = vld [vmem:[#allocation2 + $0x28] sm:$0xff]  }
  0x34   :  { %v1476_v39 = vld [vmem:[#allocation2 + $0x30] sm:$0xff]   ;;  %v1477_v40 = vld [vmem:[#allocation2 + $0x38] sm:$0xff]   ;;  %v1478_v41 = vld [vmem:[#allocation2 + $0x40] sm:$0xff]   ;;  %v112_v51 = vsub.s32 0, %v111_v50  ;;  %v120_v52 = vsub.s32 2, %v111_v50  ;;  %v116_v54 = vsub.s32 1, %v111_v50 }
  0x35   :  { %v1479_v42 = vld [vmem:[#allocation2 + $0x48] sm:$0xff]   ;;  %v1480_v43 = vld [vmem:[#allocation2 + $0x50] sm:$0xff]   ;;  %v1481_v44 = vld [vmem:[#allocation2 + $0x58] sm:$0xff]   ;;  %v124_v55 = vsub.s32 3, %v111_v50 }
  0x36   :  { %393 = vmatpush1.bf16.msra.mxu0 %v1444_v15  ;;  %586 = vmatpush1.bf16.msra.mxu1 %v1445_v16  ;;  %v1482_v45 = vld [vmem:[#allocation2 + $0x60] sm:$0xff]   ;;  %v1483_v46 = vld [vmem:[#allocation2 + $0x68] sm:$0xff]   ;;  %v1484_v47 = vld [vmem:[#allocation2 + $0x70] sm:$0xff]  }
  0x37   :  { %394 = vmatprep.subr.bf16.mxu0 %v1446_v17  ;;  %587 = vmatprep.subr.bf16.mxu1 %v1448_v18  ;;  %v1485_v48 = vld [vmem:[#allocation2 + $0x78] sm:$0xff]   ;;  %v108_v53 = vld [vmem:[%s1801_s2] sm:$0xf]  ;;  %s1565_s2 = smov [#allocation7]  }
  0x38   :  { %v1648_v56 = vrot.slane %v108_v53, %v112_v51  ;;  %v1650_v57 = vrot.slane %v108_v53, %v120_v52  ;;  %v1652_v58 = vrot.slane %v108_v53, %v116_v54  ;;  %v1654_v59 = vrot.slane %v108_v53, %v124_v55  ;;  %s1225_s13 = sshll.u32 %s1565_s2, 4  ;;  %s1226_s13 = int_to_ptr.vmem [resolvable:$true] %s1225_s13 }
  0x39   :  { %s1530_s14 = scalar_lea.vmem %s1226_s13, 8192  ;;  %p1535_p3 = scmp.lt.s32.totalorder %s1226_s13, %s1226_s13 }
  0x3a   :  { %395 = vmatpush1.bf16.msra.mxu0 %v1450_v19  ;;  %588 = vmatpush1.bf16.msra.mxu1 %v1451_v20  ;;  %p1531_p2 = scmp.ne.s32.totalorder %s1226_s13, %s1530_s14  ;;  %p1536_p4 = scmp.lt.s32.totalorder %s1530_s14, %s1530_s14 }
  0x3b   :  { %396 = vmatprep.subr.bf16.mxu0 %v1452_v21  ;;  %589 = vmatprep.subr.bf16.mxu1 %v1454_v22 }
  0x3c   :  { %p1537_p5 = por %p1536_p4, %p1535_p3 }
  0x3e   :  { %397 = vmatpush1.bf16.msra.mxu0 %v1456_v23  ;;  %590 = vmatpush1.bf16.msra.mxu1 %v1457_v24  ;;  %p1538_p6 = pnand %p1537_p5, %p1531_p2 }
  0x3f   :  { %398 = vmatprep.subr.bf16.mxu0 %v1458_v25  ;;  %591 = vmatprep.subr.bf16.mxu1 %v1460_v26 }
  0x42   :  { %399 = vmatpush1.bf16.msra.mxu0 %v1462_v27  ;;  %592 = vmatpush1.bf16.msra.mxu1 %v1463_v28 }
  0x43   :  { %400 = vmatprep.subr.bf16.mxu0 %v1464_v29  ;;  %593 = vmatprep.subr.bf16.mxu1 %v1466_v30 }
  0x46   :  { %401 = vmatpush1.bf16.msra.mxu0 %v1468_v31  ;;  %594 = vmatpush1.bf16.msra.mxu1 %v1469_v32 }
  0x49   :  { %419 = vmatmul.mubr.bf16.vlgmr.msra.gmra.mrb[0].mxu0 %v1470_v33  ;;  %612 = vmatmul.mubr.bf16.vlgmr.msra.gmra.mrb[0].mxu1 %v1470_v33 }
  0x4a   :  { %428 = vmatprep.mubr.bf16.mxu0 %v1564_v0  ;;  %621 = vmatprep.mubr.bf16.mxu1 %v1564_v0 }
  0x51   :  { %429 = vmatmul.mubr.bf16.gmra.mrb[4].mxu0 %v1471_v34  ;;  %622 = vmatmul.mubr.bf16.gmra.mrb[4].mxu1 %v1471_v34 }
  0x52   :  { %438 = vmatprep.mubr.bf16.mxu0 %v1564_v0  ;;  %631 = vmatprep.mubr.bf16.mxu1 %v1564_v0 }
  0x59   :  { %439 = vmatmul.mubr.bf16.gmra.mrb[8].mxu0 %v1472_v35  ;;  %632 = vmatmul.mubr.bf16.gmra.mrb[8].mxu1 %v1472_v35 }
  0x5a   :  { %448 = vmatprep.mubr.bf16.mxu0 %v1564_v0  ;;  %641 = vmatprep.mubr.bf16.mxu1 %v1564_v0 }
  0x61   :  { %449 = vmatmul.mubr.bf16.gmra.mrb[12].mxu0 %v1473_v36  ;;  %642 = vmatmul.mubr.bf16.gmra.mrb[12].mxu1 %v1473_v36 }
  0x62   :  { %458 = vmatprep.mubr.bf16.mxu0 %v1564_v0  ;;  %651 = vmatprep.mubr.bf16.mxu1 %v1564_v0 }
  0x69   :  { %459 = vmatmul.mubr.bf16.gmra.mrb[16].mxu0 %v1474_v37  ;;  %652 = vmatmul.mubr.bf16.gmra.mrb[16].mxu1 %v1474_v37 }
  0x6a   :  { %468 = vmatprep.mubr.bf16.mxu0 %v1564_v0  ;;  %661 = vmatprep.mubr.bf16.mxu1 %v1564_v0 }
  0x71   :  { %469 = vmatmul.mubr.bf16.gmra.mrb[20].mxu0 %v1475_v38  ;;  %662 = vmatmul.mubr.bf16.gmra.mrb[20].mxu1 %v1475_v38 }
  0x72   :  { %478 = vmatprep.mubr.bf16.mxu0 %v1564_v0  ;;  %671 = vmatprep.mubr.bf16.mxu1 %v1564_v0 }
  0x79   :  { %479 = vmatmul.mubr.bf16.gmra.mrb[24].mxu0 %v1476_v39  ;;  %672 = vmatmul.mubr.bf16.gmra.mrb[24].mxu1 %v1476_v39 }
  0x7a   :  { %488 = vmatprep.mubr.bf16.mxu0 %v1564_v0  ;;  %681 = vmatprep.mubr.bf16.mxu1 %v1564_v0 }
  0x81   :  { %489 = vmatmul.mubr.bf16.gmra.mrb[28].mxu0 %v1477_v40  ;;  %682 = vmatmul.mubr.bf16.gmra.mrb[28].mxu1 %v1477_v40 }
  0x82   :  { %498 = vmatprep.mubr.bf16.mxu0 %v1564_v0  ;;  %691 = vmatprep.mubr.bf16.mxu1 %v1564_v0 }
  0x89   :  { %499 = vmatmul.mubr.bf16.gmra.mrb[32].mxu0 %v1478_v41  ;;  %692 = vmatmul.mubr.bf16.gmra.mrb[32].mxu1 %v1478_v41 }
  0x8a   :  { %508 = vmatprep.mubr.bf16.mxu0 %v1564_v0  ;;  %701 = vmatprep.mubr.bf16.mxu1 %v1564_v0 }
  0x91   :  { %509 = vmatmul.mubr.bf16.gmra.mrb[36].mxu0 %v1479_v42  ;;  %702 = vmatmul.mubr.bf16.gmra.mrb[36].mxu1 %v1479_v42 }
  0x92   :  { %518 = vmatprep.mubr.bf16.mxu0 %v1564_v0  ;;  %711 = vmatprep.mubr.bf16.mxu1 %v1564_v0 }
  0x99   :  { %519 = vmatmul.mubr.bf16.gmra.mrb[40].mxu0 %v1480_v43  ;;  %712 = vmatmul.mubr.bf16.gmra.mrb[40].mxu1 %v1480_v43 }
  0x9a   :  { %528 = vmatprep.mubr.bf16.mxu0 %v1564_v0  ;;  %721 = vmatprep.mubr.bf16.mxu1 %v1564_v0 }
  0xa1   :  { %529 = vmatmul.mubr.bf16.gmra.mrb[44].mxu0 %v1481_v44  ;;  %722 = vmatmul.mubr.bf16.gmra.mrb[44].mxu1 %v1481_v44 }
  0xa2   :  { %538 = vmatprep.mubr.bf16.mxu0 %v1564_v0  ;;  %731 = vmatprep.mubr.bf16.mxu1 %v1564_v0 }
  0xa9   :  { %539 = vmatmul.mubr.bf16.gmra.mrb[48].mxu0 %v1482_v45  ;;  %732 = vmatmul.mubr.bf16.gmra.mrb[48].mxu1 %v1482_v45 }
  0xaa   :  { %548 = vmatprep.mubr.bf16.mxu0 %v1564_v0  ;;  %741 = vmatprep.mubr.bf16.mxu1 %v1564_v0 }
  0xb1   :  { %549 = vmatmul.mubr.bf16.gmra.mrb[52].mxu0 %v1483_v46  ;;  %742 = vmatmul.mubr.bf16.gmra.mrb[52].mxu1 %v1483_v46 }
  0xb2   :  { %558 = vmatprep.mubr.bf16.mxu0 %v1564_v0  ;;  %751 = vmatprep.mubr.bf16.mxu1 %v1564_v0 }
  0xb9   :  { %559 = vmatmul.mubr.bf16.gmra.mrb[56].mxu0 %v1484_v47  ;;  %752 = vmatmul.mubr.bf16.gmra.mrb[56].mxu1 %v1484_v47 }
  0xba   :  { %568 = vmatprep.mubr.bf16.mxu0 %v1564_v0  ;;  %761 = vmatprep.mubr.bf16.mxu1 %v1564_v0 }
  0xc1   :  { %569 = vmatmul.mubr.bf16.gmra.mrb[60].mxu0 %v1485_v48  ;;  %762 = vmatmul.mubr.bf16.gmra.mrb[60].mxu1 %v1485_v48 }
 0x11c   :  { %v420_v60 = vpop.f32.mrb[0].mxu0  ;;  %v613_v61 = vpop.f32.mrb[0].mxu1 }
 0x11d   :  { %v421_v62 = vadd.f32 %v420_v60, %v1648_v56  ;;  %v614_v63 = vadd.f32 %v613_v61, %v1650_v57  ;;  %v422_v0 = vpop.f32.mrb[1].mxu0  ;;  %v615_v1 = vpop.f32.mrb[1].mxu1 }
 0x11e   :  { %v423_v2 = vadd.f32 %v422_v0, %v1652_v58  ;;  %v616_v3 = vadd.f32 %v615_v1, %v1654_v59  ;;  %v424_v4 = vpop.f32.mrb[2].mxu0  ;;  %v617_v5 = vpop.f32.mrb[2].mxu1 }
 0x11f   :  { %v425_v6 = vadd.f32 %v424_v4, %v1648_v56  ;;  %v618_v7 = vadd.f32 %v617_v5, %v1650_v57  ;;  %v426_v8 = vpop.f32.mrb[3].mxu0  ;;  %v619_v9 = vpop.f32.mrb[3].mxu1 }
 0x120   :  { %v1350_v10 = vpack.c.bf16 %v423_v2, %v421_v62  ;;  %v1351_v11 = vpack.c.bf16 %v616_v3, %v614_v63  ;;  %v427_v12 = vadd.f32 %v426_v8, %v1652_v58  ;;  %v620_v13 = vadd.f32 %v619_v9, %v1654_v59 }
 0x122   :  { %1156 = vst [vmem:[#allocation7] sm:$0xff] %v1350_v10  ;;  %1157 = vst [vmem:[#allocation7 + $0x8] sm:$0xff] %v1351_v11  ;;  %v1352_v14 = vpack.c.bf16 %v427_v12, %v425_v6  ;;  %v1353_v15 = vpack.c.bf16 %v620_v13, %v618_v7 }
 0x124   :  { %1158 = vst [vmem:[#allocation7 + $0x10] sm:$0xff] %v1352_v14  ;;  %1159 = vst [vmem:[#allocation7 + $0x18] sm:$0xff] %v1353_v15  ;;  %v430_v16 = vpop.f32.mrb[4].mxu0  ;;  %v623_v17 = vpop.f32.mrb[4].mxu1 }
 0x125   :  { %v431_v18 = vadd.f32 %v430_v16, %v1648_v56  ;;  %v624_v19 = vadd.f32 %v623_v17, %v1650_v57  ;;  %v432_v20 = vpop.f32.mrb[5].mxu0  ;;  %v625_v21 = vpop.f32.mrb[5].mxu1 }
 0x126   :  { %v433_v22 = vadd.f32 %v432_v20, %v1652_v58  ;;  %v626_v23 = vadd.f32 %v625_v21, %v1654_v59  ;;  %v434_v24 = vpop.f32.mrb[6].mxu0  ;;  %v627_v25 = vpop.f32.mrb[6].mxu1 }
 0x127   :  { %v435_v26 = vadd.f32 %v434_v24, %v1648_v56  ;;  %v628_v27 = vadd.f32 %v627_v25, %v1650_v57  ;;  %v436_v28 = vpop.f32.mrb[7].mxu0  ;;  %v629_v29 = vpop.f32.mrb[7].mxu1 }
 0x128   :  { %v1354_v30 = vpack.c.bf16 %v433_v22, %v431_v18  ;;  %v1355_v31 = vpack.c.bf16 %v626_v23, %v624_v19  ;;  %v437_v32 = vadd.f32 %v436_v28, %v1652_v58  ;;  %v630_v33 = vadd.f32 %v629_v29, %v1654_v59 }
 0x12a   :  { %1160 = vst [vmem:[#allocation7 + $0x20] sm:$0xff] %v1354_v30  ;;  %1161 = vst [vmem:[#allocation7 + $0x28] sm:$0xff] %v1355_v31  ;;  %v1356_v34 = vpack.c.bf16 %v437_v32, %v435_v26  ;;  %v1357_v35 = vpack.c.bf16 %v630_v33, %v628_v27 }
 0x12c   :  { %1162 = vst [vmem:[#allocation7 + $0x30] sm:$0xff] %v1356_v34  ;;  %1163 = vst [vmem:[#allocation7 + $0x38] sm:$0xff] %v1357_v35  ;;  %v440_v36 = vpop.f32.mrb[8].mxu0  ;;  %v633_v37 = vpop.f32.mrb[8].mxu1 }
 0x12d   :  { %v441_v38 = vadd.f32 %v440_v36, %v1648_v56  ;;  %v634_v39 = vadd.f32 %v633_v37, %v1650_v57  ;;  %v442_v40 = vpop.f32.mrb[9].mxu0  ;;  %v635_v41 = vpop.f32.mrb[9].mxu1 }
 0x12e   :  { %v443_v42 = vadd.f32 %v442_v40, %v1652_v58  ;;  %v636_v43 = vadd.f32 %v635_v41, %v1654_v59  ;;  %v444_v44 = vpop.f32.mrb[10].mxu0  ;;  %v637_v45 = vpop.f32.mrb[10].mxu1 }
 0x12f   :  { %v445_v46 = vadd.f32 %v444_v44, %v1648_v56  ;;  %v638_v47 = vadd.f32 %v637_v45, %v1650_v57  ;;  %v446_v48 = vpop.f32.mrb[11].mxu0  ;;  %v639_v49 = vpop.f32.mrb[11].mxu1 }
 0x130   :  { %v1358_v50 = vpack.c.bf16 %v443_v42, %v441_v38  ;;  %v1359_v51 = vpack.c.bf16 %v636_v43, %v634_v39  ;;  %v447_v52 = vadd.f32 %v446_v48, %v1652_v58  ;;  %v640_v53 = vadd.f32 %v639_v49, %v1654_v59 }
 0x132   :  { %1164 = vst [vmem:[#allocation7 + $0x40] sm:$0xff] %v1358_v50  ;;  %1165 = vst [vmem:[#allocation7 + $0x48] sm:$0xff] %v1359_v51  ;;  %v1360_v54 = vpack.c.bf16 %v447_v52, %v445_v46  ;;  %v1361_v55 = vpack.c.bf16 %v640_v53, %v638_v47 }
 0x134   :  { %1166 = vst [vmem:[#allocation7 + $0x50] sm:$0xff] %v1360_v54  ;;  %1167 = vst [vmem:[#allocation7 + $0x58] sm:$0xff] %v1361_v55  ;;  %v450_v60 = vpop.f32.mrb[12].mxu0  ;;  %v643_v61 = vpop.f32.mrb[12].mxu1 }
 0x135   :  { %v451_v62 = vadd.f32 %v450_v60, %v1648_v56  ;;  %v644_v63 = vadd.f32 %v643_v61, %v1650_v57  ;;  %v452_v0 = vpop.f32.mrb[13].mxu0  ;;  %v645_v1 = vpop.f32.mrb[13].mxu1 }
 0x136   :  { %v453_v2 = vadd.f32 %v452_v0, %v1652_v58  ;;  %v646_v3 = vadd.f32 %v645_v1, %v1654_v59  ;;  %v454_v4 = vpop.f32.mrb[14].mxu0  ;;  %v647_v5 = vpop.f32.mrb[14].mxu1 }
 0x137   :  { %v455_v6 = vadd.f32 %v454_v4, %v1648_v56  ;;  %v648_v7 = vadd.f32 %v647_v5, %v1650_v57  ;;  %v456_v8 = vpop.f32.mrb[15].mxu0  ;;  %v649_v9 = vpop.f32.mrb[15].mxu1 }
 0x138   :  { %v1362_v10 = vpack.c.bf16 %v453_v2, %v451_v62  ;;  %v1363_v11 = vpack.c.bf16 %v646_v3, %v644_v63  ;;  %v457_v12 = vadd.f32 %v456_v8, %v1652_v58  ;;  %v650_v13 = vadd.f32 %v649_v9, %v1654_v59 }
 0x13a   :  { %1168 = vst [vmem:[#allocation7 + $0x60] sm:$0xff] %v1362_v10  ;;  %1169 = vst [vmem:[#allocation7 + $0x68] sm:$0xff] %v1363_v11  ;;  %v1364_v14 = vpack.c.bf16 %v457_v12, %v455_v6  ;;  %v1365_v15 = vpack.c.bf16 %v650_v13, %v648_v7 }
 0x13c   :  { %1170 = vst [vmem:[#allocation7 + $0x70] sm:$0xff] %v1364_v14  ;;  %1171 = vst [vmem:[#allocation7 + $0x78] sm:$0xff] %v1365_v15  ;;  %v460_v16 = vpop.f32.mrb[16].mxu0  ;;  %v653_v17 = vpop.f32.mrb[16].mxu1 }
 0x13d   :  { %v461_v18 = vadd.f32 %v460_v16, %v1648_v56  ;;  %v654_v19 = vadd.f32 %v653_v17, %v1650_v57  ;;  %v462_v20 = vpop.f32.mrb[17].mxu0  ;;  %v655_v21 = vpop.f32.mrb[17].mxu1 }
 0x13e   :  { %v463_v22 = vadd.f32 %v462_v20, %v1652_v58  ;;  %v656_v23 = vadd.f32 %v655_v21, %v1654_v59  ;;  %v464_v24 = vpop.f32.mrb[18].mxu0  ;;  %v657_v25 = vpop.f32.mrb[18].mxu1 }
 0x13f   :  { %v465_v26 = vadd.f32 %v464_v24, %v1648_v56  ;;  %v658_v27 = vadd.f32 %v657_v25, %v1650_v57  ;;  %v466_v28 = vpop.f32.mrb[19].mxu0  ;;  %v659_v29 = vpop.f32.mrb[19].mxu1 }
 0x140   :  { %v1366_v30 = vpack.c.bf16 %v463_v22, %v461_v18  ;;  %v1367_v31 = vpack.c.bf16 %v656_v23, %v654_v19  ;;  %v467_v32 = vadd.f32 %v466_v28, %v1652_v58  ;;  %v660_v33 = vadd.f32 %v659_v29, %v1654_v59 }
 0x142   :  { %1172 = vst [vmem:[#allocation7 + $0x80] sm:$0xff] %v1366_v30  ;;  %1173 = vst [vmem:[#allocation7 + $0x88] sm:$0xff] %v1367_v31  ;;  %v1368_v34 = vpack.c.bf16 %v467_v32, %v465_v26  ;;  %v1369_v35 = vpack.c.bf16 %v660_v33, %v658_v27 }
 0x144   :  { %1174 = vst [vmem:[#allocation7 + $0x90] sm:$0xff] %v1368_v34  ;;  %1175 = vst [vmem:[#allocation7 + $0x98] sm:$0xff] %v1369_v35  ;;  %v470_v36 = vpop.f32.mrb[20].mxu0  ;;  %v663_v37 = vpop.f32.mrb[20].mxu1 }
 0x145   :  { %v471_v38 = vadd.f32 %v470_v36, %v1648_v56  ;;  %v664_v39 = vadd.f32 %v663_v37, %v1650_v57  ;;  %v472_v40 = vpop.f32.mrb[21].mxu0  ;;  %v665_v41 = vpop.f32.mrb[21].mxu1 }
 0x146   :  { %v473_v42 = vadd.f32 %v472_v40, %v1652_v58  ;;  %v666_v43 = vadd.f32 %v665_v41, %v1654_v59  ;;  %v474_v44 = vpop.f32.mrb[22].mxu0  ;;  %v667_v45 = vpop.f32.mrb[22].mxu1 }
 0x147   :  { %v475_v46 = vadd.f32 %v474_v44, %v1648_v56  ;;  %v668_v47 = vadd.f32 %v667_v45, %v1650_v57  ;;  %v476_v48 = vpop.f32.mrb[23].mxu0  ;;  %v669_v49 = vpop.f32.mrb[23].mxu1 }
 0x148   :  { %v1370_v50 = vpack.c.bf16 %v473_v42, %v471_v38  ;;  %v1371_v51 = vpack.c.bf16 %v666_v43, %v664_v39  ;;  %v477_v52 = vadd.f32 %v476_v48, %v1652_v58  ;;  %v670_v53 = vadd.f32 %v669_v49, %v1654_v59 }
 0x14a   :  { %1176 = vst [vmem:[#allocation7 + $0xa0] sm:$0xff] %v1370_v50  ;;  %1177 = vst [vmem:[#allocation7 + $0xa8] sm:$0xff] %v1371_v51  ;;  %v1372_v54 = vpack.c.bf16 %v477_v52, %v475_v46  ;;  %v1373_v55 = vpack.c.bf16 %v670_v53, %v668_v47 }
 0x14c   :  { %1178 = vst [vmem:[#allocation7 + $0xb0] sm:$0xff] %v1372_v54  ;;  %1179 = vst [vmem:[#allocation7 + $0xb8] sm:$0xff] %v1373_v55  ;;  %v480_v60 = vpop.f32.mrb[24].mxu0  ;;  %v673_v61 = vpop.f32.mrb[24].mxu1 }
 0x14d   :  { %v481_v62 = vadd.f32 %v480_v60, %v1648_v56  ;;  %v674_v63 = vadd.f32 %v673_v61, %v1650_v57  ;;  %v482_v0 = vpop.f32.mrb[25].mxu0  ;;  %v675_v1 = vpop.f32.mrb[25].mxu1 }
 0x14e   :  { %v483_v2 = vadd.f32 %v482_v0, %v1652_v58  ;;  %v676_v3 = vadd.f32 %v675_v1, %v1654_v59  ;;  %v484_v4 = vpop.f32.mrb[26].mxu0  ;;  %v677_v5 = vpop.f32.mrb[26].mxu1 }
 0x14f   :  { %v485_v6 = vadd.f32 %v484_v4, %v1648_v56  ;;  %v678_v7 = vadd.f32 %v677_v5, %v1650_v57  ;;  %v486_v8 = vpop.f32.mrb[27].mxu0  ;;  %v679_v9 = vpop.f32.mrb[27].mxu1 }
 0x150   :  { %v1374_v10 = vpack.c.bf16 %v483_v2, %v481_v62  ;;  %v1375_v11 = vpack.c.bf16 %v676_v3, %v674_v63  ;;  %v487_v12 = vadd.f32 %v486_v8, %v1652_v58  ;;  %v680_v13 = vadd.f32 %v679_v9, %v1654_v59 }
 0x152   :  { %1180 = vst [vmem:[#allocation7 + $0xc0] sm:$0xff] %v1374_v10  ;;  %1181 = vst [vmem:[#allocation7 + $0xc8] sm:$0xff] %v1375_v11  ;;  %v1376_v14 = vpack.c.bf16 %v487_v12, %v485_v6  ;;  %v1377_v15 = vpack.c.bf16 %v680_v13, %v678_v7 }
 0x154   :  { %1182 = vst [vmem:[#allocation7 + $0xd0] sm:$0xff] %v1376_v14  ;;  %1183 = vst [vmem:[#allocation7 + $0xd8] sm:$0xff] %v1377_v15  ;;  %v490_v16 = vpop.f32.mrb[28].mxu0  ;;  %v683_v17 = vpop.f32.mrb[28].mxu1 }
 0x155   :  { %v491_v18 = vadd.f32 %v490_v16, %v1648_v56  ;;  %v684_v19 = vadd.f32 %v683_v17, %v1650_v57  ;;  %v492_v20 = vpop.f32.mrb[29].mxu0  ;;  %v685_v21 = vpop.f32.mrb[29].mxu1 }
 0x156   :  { %v493_v22 = vadd.f32 %v492_v20, %v1652_v58  ;;  %v686_v23 = vadd.f32 %v685_v21, %v1654_v59  ;;  %v494_v24 = vpop.f32.mrb[30].mxu0  ;;  %v687_v25 = vpop.f32.mrb[30].mxu1 }
 0x157   :  { %v495_v26 = vadd.f32 %v494_v24, %v1648_v56  ;;  %v688_v27 = vadd.f32 %v687_v25, %v1650_v57  ;;  %v496_v28 = vpop.f32.mrb[31].mxu0  ;;  %v689_v29 = vpop.f32.mrb[31].mxu1 }
 0x158   :  { %v1378_v30 = vpack.c.bf16 %v493_v22, %v491_v18  ;;  %v1379_v31 = vpack.c.bf16 %v686_v23, %v684_v19  ;;  %v497_v32 = vadd.f32 %v496_v28, %v1652_v58  ;;  %v690_v33 = vadd.f32 %v689_v29, %v1654_v59 }
 0x15a   :  { %1184 = vst [vmem:[#allocation7 + $0xe0] sm:$0xff] %v1378_v30  ;;  %1185 = vst [vmem:[#allocation7 + $0xe8] sm:$0xff] %v1379_v31  ;;  %v1380_v34 = vpack.c.bf16 %v497_v32, %v495_v26  ;;  %v1381_v35 = vpack.c.bf16 %v690_v33, %v688_v27 }
 0x15c   :  { %1186 = vst [vmem:[#allocation7 + $0xf0] sm:$0xff] %v1380_v34  ;;  %1187 = vst [vmem:[#allocation7 + $0xf8] sm:$0xff] %v1381_v35  ;;  %v500_v36 = vpop.f32.mrb[32].mxu0  ;;  %v693_v37 = vpop.f32.mrb[32].mxu1 }
 0x15d   :  { %v501_v38 = vadd.f32 %v500_v36, %v1648_v56  ;;  %v694_v39 = vadd.f32 %v693_v37, %v1650_v57  ;;  %v502_v40 = vpop.f32.mrb[33].mxu0  ;;  %v695_v41 = vpop.f32.mrb[33].mxu1 }
 0x15e   :  { %v503_v42 = vadd.f32 %v502_v40, %v1652_v58  ;;  %v696_v43 = vadd.f32 %v695_v41, %v1654_v59  ;;  %v504_v44 = vpop.f32.mrb[34].mxu0  ;;  %v697_v45 = vpop.f32.mrb[34].mxu1 }
 0x15f   :  { %v505_v46 = vadd.f32 %v504_v44, %v1648_v56  ;;  %v698_v47 = vadd.f32 %v697_v45, %v1650_v57  ;;  %v506_v48 = vpop.f32.mrb[35].mxu0  ;;  %v699_v49 = vpop.f32.mrb[35].mxu1 }
 0x160   :  { %v1382_v50 = vpack.c.bf16 %v503_v42, %v501_v38  ;;  %v1383_v51 = vpack.c.bf16 %v696_v43, %v694_v39  ;;  %v507_v52 = vadd.f32 %v506_v48, %v1652_v58  ;;  %v700_v53 = vadd.f32 %v699_v49, %v1654_v59 }
 0x162   :  { %1188 = vst [vmem:[#allocation7 + $0x100] sm:$0xff] %v1382_v50  ;;  %1189 = vst [vmem:[#allocation7 + $0x108] sm:$0xff] %v1383_v51  ;;  %v1384_v54 = vpack.c.bf16 %v507_v52, %v505_v46  ;;  %v1385_v55 = vpack.c.bf16 %v700_v53, %v698_v47 }
 0x164   :  { %1190 = vst [vmem:[#allocation7 + $0x110] sm:$0xff] %v1384_v54  ;;  %1191 = vst [vmem:[#allocation7 + $0x118] sm:$0xff] %v1385_v55  ;;  %v510_v60 = vpop.f32.mrb[36].mxu0  ;;  %v703_v61 = vpop.f32.mrb[36].mxu1 }
 0x165   :  { %v511_v62 = vadd.f32 %v510_v60, %v1648_v56  ;;  %v704_v63 = vadd.f32 %v703_v61, %v1650_v57  ;;  %v512_v0 = vpop.f32.mrb[37].mxu0  ;;  %v705_v1 = vpop.f32.mrb[37].mxu1 }
 0x166   :  { %v513_v2 = vadd.f32 %v512_v0, %v1652_v58  ;;  %v706_v3 = vadd.f32 %v705_v1, %v1654_v59  ;;  %v514_v4 = vpop.f32.mrb[38].mxu0  ;;  %v707_v5 = vpop.f32.mrb[38].mxu1 }
 0x167   :  { %v515_v6 = vadd.f32 %v514_v4, %v1648_v56  ;;  %v708_v7 = vadd.f32 %v707_v5, %v1650_v57  ;;  %v516_v8 = vpop.f32.mrb[39].mxu0  ;;  %v709_v9 = vpop.f32.mrb[39].mxu1 }
 0x168   :  { %v1386_v10 = vpack.c.bf16 %v513_v2, %v511_v62  ;;  %v1387_v11 = vpack.c.bf16 %v706_v3, %v704_v63  ;;  %v517_v12 = vadd.f32 %v516_v8, %v1652_v58  ;;  %v710_v13 = vadd.f32 %v709_v9, %v1654_v59 }
 0x16a   :  { %1192 = vst [vmem:[#allocation7 + $0x120] sm:$0xff] %v1386_v10  ;;  %1193 = vst [vmem:[#allocation7 + $0x128] sm:$0xff] %v1387_v11  ;;  %v1388_v14 = vpack.c.bf16 %v517_v12, %v515_v6  ;;  %v1389_v15 = vpack.c.bf16 %v710_v13, %v708_v7 }
 0x16c   :  { %1194 = vst [vmem:[#allocation7 + $0x130] sm:$0xff] %v1388_v14  ;;  %1195 = vst [vmem:[#allocation7 + $0x138] sm:$0xff] %v1389_v15  ;;  %v520_v16 = vpop.f32.mrb[40].mxu0  ;;  %v713_v17 = vpop.f32.mrb[40].mxu1 }
 0x16d   :  { %v521_v18 = vadd.f32 %v520_v16, %v1648_v56  ;;  %v714_v19 = vadd.f32 %v713_v17, %v1650_v57  ;;  %v522_v20 = vpop.f32.mrb[41].mxu0  ;;  %v715_v21 = vpop.f32.mrb[41].mxu1 }
 0x16e   :  { %v523_v22 = vadd.f32 %v522_v20, %v1652_v58  ;;  %v716_v23 = vadd.f32 %v715_v21, %v1654_v59  ;;  %v524_v24 = vpop.f32.mrb[42].mxu0  ;;  %v717_v25 = vpop.f32.mrb[42].mxu1 }
 0x16f   :  { %v525_v26 = vadd.f32 %v524_v24, %v1648_v56  ;;  %v718_v27 = vadd.f32 %v717_v25, %v1650_v57  ;;  %v526_v28 = vpop.f32.mrb[43].mxu0  ;;  %v719_v29 = vpop.f32.mrb[43].mxu1 }
 0x170   :  { %v1390_v30 = vpack.c.bf16 %v523_v22, %v521_v18  ;;  %v1391_v31 = vpack.c.bf16 %v716_v23, %v714_v19  ;;  %v527_v32 = vadd.f32 %v526_v28, %v1652_v58  ;;  %v720_v33 = vadd.f32 %v719_v29, %v1654_v59 }
 0x172   :  { %1196 = vst [vmem:[#allocation7 + $0x140] sm:$0xff] %v1390_v30  ;;  %1197 = vst [vmem:[#allocation7 + $0x148] sm:$0xff] %v1391_v31  ;;  %v1392_v34 = vpack.c.bf16 %v527_v32, %v525_v26  ;;  %v1393_v35 = vpack.c.bf16 %v720_v33, %v718_v27 }
 0x174   :  { %1198 = vst [vmem:[#allocation7 + $0x150] sm:$0xff] %v1392_v34  ;;  %1199 = vst [vmem:[#allocation7 + $0x158] sm:$0xff] %v1393_v35  ;;  %v530_v36 = vpop.f32.mrb[44].mxu0  ;;  %v723_v37 = vpop.f32.mrb[44].mxu1 }
 0x175   :  { %v531_v38 = vadd.f32 %v530_v36, %v1648_v56  ;;  %v724_v39 = vadd.f32 %v723_v37, %v1650_v57  ;;  %v532_v40 = vpop.f32.mrb[45].mxu0  ;;  %v725_v41 = vpop.f32.mrb[45].mxu1 }
 0x176   :  { %v533_v42 = vadd.f32 %v532_v40, %v1652_v58  ;;  %v726_v43 = vadd.f32 %v725_v41, %v1654_v59  ;;  %v534_v44 = vpop.f32.mrb[46].mxu0  ;;  %v727_v45 = vpop.f32.mrb[46].mxu1 }
 0x177   :  { %v535_v46 = vadd.f32 %v534_v44, %v1648_v56  ;;  %v728_v47 = vadd.f32 %v727_v45, %v1650_v57  ;;  %v536_v48 = vpop.f32.mrb[47].mxu0  ;;  %v729_v49 = vpop.f32.mrb[47].mxu1 }
 0x178   :  { %v1394_v50 = vpack.c.bf16 %v533_v42, %v531_v38  ;;  %v1395_v51 = vpack.c.bf16 %v726_v43, %v724_v39  ;;  %v537_v52 = vadd.f32 %v536_v48, %v1652_v58  ;;  %v730_v53 = vadd.f32 %v729_v49, %v1654_v59 }
 0x17a   :  { %1200 = vst [vmem:[#allocation7 + $0x160] sm:$0xff] %v1394_v50  ;;  %1201 = vst [vmem:[#allocation7 + $0x168] sm:$0xff] %v1395_v51  ;;  %v1396_v54 = vpack.c.bf16 %v537_v52, %v535_v46  ;;  %v1397_v55 = vpack.c.bf16 %v730_v53, %v728_v47 }
 0x17c   :  { %1202 = vst [vmem:[#allocation7 + $0x170] sm:$0xff] %v1396_v54  ;;  %1203 = vst [vmem:[#allocation7 + $0x178] sm:$0xff] %v1397_v55  ;;  %v540_v60 = vpop.f32.mrb[48].mxu0  ;;  %v733_v61 = vpop.f32.mrb[48].mxu1 }
 0x17d   :  { %v541_v62 = vadd.f32 %v540_v60, %v1648_v56  ;;  %v734_v63 = vadd.f32 %v733_v61, %v1650_v57  ;;  %v542_v0 = vpop.f32.mrb[49].mxu0  ;;  %v735_v1 = vpop.f32.mrb[49].mxu1 }
 0x17e   :  { %v543_v2 = vadd.f32 %v542_v0, %v1652_v58  ;;  %v736_v3 = vadd.f32 %v735_v1, %v1654_v59  ;;  %v544_v4 = vpop.f32.mrb[50].mxu0  ;;  %v737_v5 = vpop.f32.mrb[50].mxu1 }
 0x17f   :  { %v545_v6 = vadd.f32 %v544_v4, %v1648_v56  ;;  %v738_v7 = vadd.f32 %v737_v5, %v1650_v57  ;;  %v546_v8 = vpop.f32.mrb[51].mxu0  ;;  %v739_v9 = vpop.f32.mrb[51].mxu1 }
 0x180   :  { %v1398_v10 = vpack.c.bf16 %v543_v2, %v541_v62  ;;  %v1399_v11 = vpack.c.bf16 %v736_v3, %v734_v63  ;;  %v547_v12 = vadd.f32 %v546_v8, %v1652_v58  ;;  %v740_v13 = vadd.f32 %v739_v9, %v1654_v59 }
 0x182   :  { %1204 = vst [vmem:[#allocation7 + $0x180] sm:$0xff] %v1398_v10  ;;  %1205 = vst [vmem:[#allocation7 + $0x188] sm:$0xff] %v1399_v11  ;;  %v1400_v14 = vpack.c.bf16 %v547_v12, %v545_v6  ;;  %v1401_v15 = vpack.c.bf16 %v740_v13, %v738_v7 }
 0x184   :  { %1206 = vst [vmem:[#allocation7 + $0x190] sm:$0xff] %v1400_v14  ;;  %1207 = vst [vmem:[#allocation7 + $0x198] sm:$0xff] %v1401_v15  ;;  %v550_v16 = vpop.f32.mrb[52].mxu0  ;;  %v743_v17 = vpop.f32.mrb[52].mxu1 }
 0x185   :  { %v551_v18 = vadd.f32 %v550_v16, %v1648_v56  ;;  %v744_v19 = vadd.f32 %v743_v17, %v1650_v57  ;;  %v552_v20 = vpop.f32.mrb[53].mxu0  ;;  %v745_v21 = vpop.f32.mrb[53].mxu1 }
 0x186   :  { %v553_v22 = vadd.f32 %v552_v20, %v1652_v58  ;;  %v746_v23 = vadd.f32 %v745_v21, %v1654_v59  ;;  %v554_v24 = vpop.f32.mrb[54].mxu0  ;;  %v747_v25 = vpop.f32.mrb[54].mxu1 }
 0x187   :  { %v555_v26 = vadd.f32 %v554_v24, %v1648_v56  ;;  %v748_v27 = vadd.f32 %v747_v25, %v1650_v57  ;;  %v556_v28 = vpop.f32.mrb[55].mxu0  ;;  %v749_v29 = vpop.f32.mrb[55].mxu1 }
 0x188   :  { %v1402_v30 = vpack.c.bf16 %v553_v22, %v551_v18  ;;  %v1403_v31 = vpack.c.bf16 %v746_v23, %v744_v19  ;;  %v557_v32 = vadd.f32 %v556_v28, %v1652_v58  ;;  %v750_v33 = vadd.f32 %v749_v29, %v1654_v59 }
 0x18a   :  { %1208 = vst [vmem:[#allocation7 + $0x1a0] sm:$0xff] %v1402_v30  ;;  %1209 = vst [vmem:[#allocation7 + $0x1a8] sm:$0xff] %v1403_v31  ;;  %v1404_v34 = vpack.c.bf16 %v557_v32, %v555_v26  ;;  %v1405_v35 = vpack.c.bf16 %v750_v33, %v748_v27 }
 0x18c   :  { %1210 = vst [vmem:[#allocation7 + $0x1b0] sm:$0xff] %v1404_v34  ;;  %1211 = vst [vmem:[#allocation7 + $0x1b8] sm:$0xff] %v1405_v35  ;;  %v560_v36 = vpop.f32.mrb[56].mxu0  ;;  %v753_v37 = vpop.f32.mrb[56].mxu1 }
 0x18d   :  { %v561_v38 = vadd.f32 %v560_v36, %v1648_v56  ;;  %v754_v39 = vadd.f32 %v753_v37, %v1650_v57  ;;  %v562_v40 = vpop.f32.mrb[57].mxu0  ;;  %v755_v41 = vpop.f32.mrb[57].mxu1 }
 0x18e   :  { %v563_v42 = vadd.f32 %v562_v40, %v1652_v58  ;;  %v756_v43 = vadd.f32 %v755_v41, %v1654_v59  ;;  %v564_v44 = vpop.f32.mrb[58].mxu0  ;;  %v757_v45 = vpop.f32.mrb[58].mxu1 }
 0x18f   :  { %v565_v46 = vadd.f32 %v564_v44, %v1648_v56  ;;  %v758_v47 = vadd.f32 %v757_v45, %v1650_v57  ;;  %v566_v48 = vpop.f32.mrb[59].mxu0  ;;  %v759_v49 = vpop.f32.mrb[59].mxu1 }
 0x190   :  { %v1406_v50 = vpack.c.bf16 %v563_v42, %v561_v38  ;;  %v1407_v51 = vpack.c.bf16 %v756_v43, %v754_v39  ;;  %v567_v52 = vadd.f32 %v566_v48, %v1652_v58  ;;  %v760_v53 = vadd.f32 %v759_v49, %v1654_v59 }
 0x192   :  { %1212 = vst [vmem:[#allocation7 + $0x1c0] sm:$0xff] %v1406_v50  ;;  %1213 = vst [vmem:[#allocation7 + $0x1c8] sm:$0xff] %v1407_v51  ;;  %v1408_v54 = vpack.c.bf16 %v567_v52, %v565_v46  ;;  %v1409_v55 = vpack.c.bf16 %v760_v53, %v758_v47 }
 0x194   :  { %1214 = vst [vmem:[#allocation7 + $0x1d0] sm:$0xff] %v1408_v54  ;;  %1215 = vst [vmem:[#allocation7 + $0x1d8] sm:$0xff] %v1409_v55  ;;  %v570_v60 = vpop.f32.mrb[60].mxu0  ;;  %v763_v61 = vpop.f32.mrb[60].mxu1 }
 0x195   :  { %v571_v62 = vadd.f32 %v570_v60, %v1648_v56  ;;  %v764_v63 = vadd.f32 %v763_v61, %v1650_v57  ;;  %v572_v0 = vpop.f32.mrb[61].mxu0  ;;  %v765_v1 = vpop.f32.mrb[61].mxu1 }
 0x196   :  { %v573_v2 = vadd.f32 %v572_v0, %v1652_v58  ;;  %v766_v3 = vadd.f32 %v765_v1, %v1654_v59  ;;  %v574_v4 = vpop.f32.mrb[62].mxu0  ;;  %v767_v5 = vpop.f32.mrb[62].mxu1 }
 0x197   :  { %v575_v6 = vadd.f32 %v574_v4, %v1648_v56  ;;  %v768_v7 = vadd.f32 %v767_v5, %v1650_v57  ;;  %v576_v8 = vpop.f32.mrb[63].mxu0  ;;  %v769_v9 = vpop.f32.mrb[63].mxu1 }
 0x198   :  { %v1410_v10 = vpack.c.bf16 %v573_v2, %v571_v62  ;;  %v1411_v11 = vpack.c.bf16 %v766_v3, %v764_v63  ;;  %v577_v12 = vadd.f32 %v576_v8, %v1652_v58  ;;  %v770_v13 = vadd.f32 %v769_v9, %v1654_v59 }
 0x19a   :  { %1216 = vst [vmem:[#allocation7 + $0x1e0] sm:$0xff] %v1410_v10  ;;  %1217 = vst [vmem:[#allocation7 + $0x1e8] sm:$0xff] %v1411_v11  ;;  %v1412_v14 = vpack.c.bf16 %v577_v12, %v575_v6  ;;  %v1413_v15 = vpack.c.bf16 %v770_v13, %v768_v7 }
 0x19c   :  { %1218 = vst [vmem:[#allocation7 + $0x1f0] sm:$0xff] %v1412_v14  ;;  %1219 = vst [vmem:[#allocation7 + $0x1f8] sm:$0xff] %v1413_v15 }
 0x19d   :  { %1541 = shalt.err (!%p1538_p6)
}
 0x19e   :  { %s1542_s17 = scalar_lea.hbm %s1802_s3, 8192 }
 0x19f   :  { %p1543_p7 = scmp.ne.s32.totalorder %s1802_s3, %s1542_s17  ;;  %p1546_p8 = scmp.lt.u32.totalorder %s1542_s17, %s1802_s3 }
 0x1a1   :  { %p1548_p9 = pnand %p1546_p8, %p1543_p7 }
 0x1a3   :  { %1551 = shalt.err (!%p1548_p9)
}
 0x1a4   :  { %1231 = dma.vmem_to_hbm [thread:$0]  %s1226_s13, 8192, %s1802_s3, [#allocation4], %s1562_s0, %s1562_s0, %s1563_s9  }
 0x1a5   :  { %1556 = dma.done.wait [#allocation4], 8192  }
 0x1a6   :  { %1557 = vsyncadd [#allocation4], 4294959104 }
 0x1a7   :  { %1235 = vsyncpa [#allocation3], 1 }
 0x1a8   :  { %1236 = vsyncpa [#allocation6], 1 }
 0x1a9   :  { %1237 = vsyncpa [#allocation4], 1 }

</bundles_post_ra>
